<compile_context>
chip_gen: v5e
topology: v5e:2x2
jax: 0.10.0
libtpu: 0.0.40
codegen_flags: <defaults>
</compile_context>

<pallas_src>
import functools

import jax
import jax.numpy as jnp
from jax import lax
from jax.experimental import pallas as pl
from jax.experimental.pallas import tpu as pltpu

_EPS = 1e-8  # matches F.cosine_similarity eps default


def _convirt_kernel(img_ref, fnd_ref, imp_ref, out_ref, *,
                    scale, temperature, weight):
    img = img_ref[...].astype(jnp.float32)
    fnd = fnd_ref[...].astype(jnp.float32)
    imp = imp_ref[...].astype(jnp.float32)
    txt = 0.5 * (fnd + imp)  # torch.mean(torch.stack([f, i], 0), 0)

    inv_t = 1.0 / temperature

    def unit_rows(x):
        # x_i / max(||x_i||, eps): only a [B,1] divide, so the cosine matrix
        # later comes straight off the MXU with no [B,B] division.
        n = jnp.sqrt(jnp.sum(x * x, axis=-1, keepdims=True))
        return x / jnp.maximum(n, _EPS)

    img_hat = unit_rows(img)
    fnd_hat = unit_rows(fnd)
    imp_hat = unit_rows(imp)
    txt_hat = unit_rows(txt)

    def pair_means(a_hat, b_hat):
        """Mean losses (mean CL(a,b), mean CL(b,a)) sharing one matmul + one exp."""
        a_scaled = a_hat * inv_t  # fold 1/T into the smaller [B,D] operand
        # S[i,j] = cos(a_i, b_j) / T  (MXU, f32 accumulation)
        s = lax.dot_general(a_scaled, b_hat, (((1,), (1,)), ((), ())),
                            preferred_element_type=jnp.float32)     # [B,B]
        e = jnp.exp(s)                                               # [B,B], EUP
        # Shared numerator term: cos(a_i, b_i)/T (symmetric for both directions).
        diag = jnp.sum(a_scaled * b_hat, axis=-1, keepdims=True)     # [B,1]
        mean_diag = jnp.mean(diag)
        # CL(a,b)_i = -diag_i + log(sum_j exp(S[i,j]))  -> row sums of e
        # CL(b,a)_i = -diag_i + log(sum_j exp(S[j,i]))  -> column sums of e
        mean_ab = jnp.mean(jnp.log(jnp.sum(e, axis=1, keepdims=True))) - mean_diag
        mean_ba = jnp.mean(jnp.log(jnp.sum(e, axis=0, keepdims=True))) - mean_diag
        return mean_ab, mean_ba

    mean_f2i, mean_i2f = pair_means(fnd_hat, imp_hat)   # findings <-> impressions
    mean_i2t, mean_t2i = pair_means(img_hat, txt_hat)   # image    <-> text

    local_loss = weight * mean_f2i + (1.0 - weight) * mean_i2f
    global_loss = weight * mean_i2t + (1.0 - weight) * mean_t2i
    out_ref[0, 0] = scale * global_loss + (1.0 - scale) * local_loss


def modified_convirt_loss(image_batch, findings_batch, impressions_batch,
                          scale=0.75, temperature=1.0, weight=0.99):
    B, D = image_batch.shape
    assert findings_batch.shape == (B, D) and impressions_batch.shape == (B, D)

    # VMEM budget: 3 double-buffered [B,D] inputs + txt + 4 normalized copies
    # + 2 [B,B] matrices (S and exp(S)), all f32, plus headroom. Clamped to stay
    # within physical VMEM on all chips (64 MiB on v7x).
    vmem_bytes = 4 * (2 * 3 * B * D + 5 * B * D + 4 * B * B) + (1 << 20)
    vmem_bytes = min(max(vmem_bytes, 16 * 1024 * 1024), 64 * 1024 * 1024)

    kernel = functools.partial(_convirt_kernel,
                               scale=float(scale),
                               temperature=float(temperature),
                               weight=float(weight))
    out = pl.pallas_call(
        kernel,
        out_shape=jax.ShapeDtypeStruct((1, 1), jnp.float32),
        in_specs=[
            pl.BlockSpec((B, D), lambda: (0, 0)),
            pl.BlockSpec((B, D), lambda: (0, 0)),
            pl.BlockSpec((B, D), lambda: (0, 0)),
        ],
        # Scalar reduction result lives in SMEM (no padded (8,128) VMEM tile).
        out_specs=pl.BlockSpec(memory_space=pltpu.MemorySpace.SMEM),
        compiler_params=pltpu.CompilerParams(vmem_limit_bytes=vmem_bytes),
    )(image_batch, findings_batch, impressions_batch)
    return out[0, 0]


# ---------------- pure-JAX reference (mirrors the PyTorch loops) ----------------
def _ref_contrastive(v, u, temperature):
    vn = jnp.linalg.norm(v, axis=-1, keepdims=True)
    un = jnp.linalg.norm(u, axis=-1, keepdims=True)
    num_cos = jnp.sum(v * u, axis=-1) / jnp.maximum(vn[:, 0] * un[:, 0], _EPS)
    s = (v @ u.T) / jnp.maximum(vn * un.T, _EPS)
    numerator = jnp.exp(num_cos / temperature)
    denominator = jnp.sum(jnp.exp(s / temperature), axis=-1)
    return -jnp.log(numerator / denominator)


def _ref_convirt(img, fnd, imp, scale=0.75, temperature=1.0, weight=0.99):
    txt = 0.5 * (fnd + imp)
    f2i = _ref_contrastive(fnd, imp, temperature)
    i2f = _ref_contrastive(imp, fnd, temperature)
    i2t = _ref_contrastive(img, txt, temperature)
    t2i = _ref_contrastive(txt, img, temperature)
    local = jnp.mean(weight * f2i + (1 - weight) * i2f)
    glob = jnp.mean(weight * i2t + (1 - weight) * t2i)
    return scale * glob + (1 - scale) * local


if __name__ == "__main__":
    B, D = 8, 32  # small batch of embeddings; image/findings/impressions share dim D
    key = jax.random.PRNGKey(0)
    k1, k2, k3 = jax.random.split(key, 3)
    image = jax.random.normal(k1, (B, D), dtype=jnp.float32)
    findings = jax.random.normal(k2, (B, D), dtype=jnp.float32)
    impressions = jax.random.normal(k3, (B, D), dtype=jnp.float32)

    loss = modified_convirt_loss(image, findings, impressions)
    loss = jax.block_until_ready(loss)

    ref = _ref_convirt(image, findings, impressions)
    assert jnp.allclose(loss, ref, rtol=1e-5, atol=1e-5), (loss, ref)

    print("KERNEL_OK")
</pallas_src>

<mosaic_0001>
module attributes {stable_mosaic.version = 11 : i64} {
  func.func @_convirt_kernel(%arg0: memref<8x32xf32, #tpu.memory_space<vmem>>, %arg1: memref<8x32xf32, #tpu.memory_space<vmem>>, %arg2: memref<8x32xf32, #tpu.memory_space<vmem>>, %arg3: memref<1x1xf32, #tpu.memory_space<smem>>) attributes {dimension_semantics = [], scalar_prefetch = 0 : i64, scratch_operands = 0 : i64, tpu.core_type = #tpu.core_type<tc>} {
    %c0 = arith.constant 0 : index
    %c0_0 = arith.constant 0 : index
    %0 = vector.load %arg0[%c0, %c0_0] : memref<8x32xf32, #tpu.memory_space<vmem>>, vector<8x32xf32>
    %c0_1 = arith.constant 0 : index
    %c0_2 = arith.constant 0 : index
    %1 = vector.load %arg1[%c0_1, %c0_2] : memref<8x32xf32, #tpu.memory_space<vmem>>, vector<8x32xf32>
    %c0_3 = arith.constant 0 : index
    %c0_4 = arith.constant 0 : index
    %2 = vector.load %arg2[%c0_3, %c0_4] : memref<8x32xf32, #tpu.memory_space<vmem>>, vector<8x32xf32>
    %3 = arith.addf %1, %2 : vector<8x32xf32>
    %cst = arith.constant 5.000000e-01 : f32
    %4 = vector.broadcast %cst : f32 to vector<8x32xf32>
    %5 = arith.mulf %4, %3 : vector<8x32xf32>
    %6 = arith.mulf %0, %0 : vector<8x32xf32>
    %cst_5 = arith.constant dense<0.000000e+00> : vector<8xf32>
    %7 = vector.multi_reduction <add>, %6, %cst_5 [1] : vector<8x32xf32> to vector<8xf32>
    %8 = vector.shape_cast %7 : vector<8xf32> to vector<8x1xf32>
    %9 = math.sqrt %8 : vector<8x1xf32>
    %cst_6 = arith.constant 9.99999993E-9 : f32
    %10 = vector.broadcast %cst_6 : f32 to vector<8x1xf32>
    %11 = arith.maximumf %9, %10 : vector<8x1xf32>
    %12 = vector.broadcast %11 : vector<8x1xf32> to vector<8x32xf32>
    %13 = arith.divf %0, %12 : vector<8x32xf32>
    %14 = arith.mulf %1, %1 : vector<8x32xf32>
    %cst_7 = arith.constant dense<0.000000e+00> : vector<8xf32>
    %15 = vector.multi_reduction <add>, %14, %cst_7 [1] : vector<8x32xf32> to vector<8xf32>
    %16 = vector.shape_cast %15 : vector<8xf32> to vector<8x1xf32>
    %17 = math.sqrt %16 : vector<8x1xf32>
    %cst_8 = arith.constant 9.99999993E-9 : f32
    %18 = vector.broadcast %cst_8 : f32 to vector<8x1xf32>
    %19 = arith.maximumf %17, %18 : vector<8x1xf32>
    %20 = vector.broadcast %19 : vector<8x1xf32> to vector<8x32xf32>
    %21 = arith.divf %1, %20 : vector<8x32xf32>
    %22 = arith.mulf %2, %2 : vector<8x32xf32>
    %cst_9 = arith.constant dense<0.000000e+00> : vector<8xf32>
    %23 = vector.multi_reduction <add>, %22, %cst_9 [1] : vector<8x32xf32> to vector<8xf32>
    %24 = vector.shape_cast %23 : vector<8xf32> to vector<8x1xf32>
    %25 = math.sqrt %24 : vector<8x1xf32>
    %cst_10 = arith.constant 9.99999993E-9 : f32
    %26 = vector.broadcast %cst_10 : f32 to vector<8x1xf32>
    %27 = arith.maximumf %25, %26 : vector<8x1xf32>
    %28 = vector.broadcast %27 : vector<8x1xf32> to vector<8x32xf32>
    %29 = arith.divf %2, %28 : vector<8x32xf32>
    %30 = arith.mulf %5, %5 : vector<8x32xf32>
    %cst_11 = arith.constant dense<0.000000e+00> : vector<8xf32>
    %31 = vector.multi_reduction <add>, %30, %cst_11 [1] : vector<8x32xf32> to vector<8xf32>
    %32 = vector.shape_cast %31 : vector<8xf32> to vector<8x1xf32>
    %33 = math.sqrt %32 : vector<8x1xf32>
    %cst_12 = arith.constant 9.99999993E-9 : f32
    %34 = vector.broadcast %cst_12 : f32 to vector<8x1xf32>
    %35 = arith.maximumf %33, %34 : vector<8x1xf32>
    %36 = vector.broadcast %35 : vector<8x1xf32> to vector<8x32xf32>
    %37 = arith.divf %5, %36 : vector<8x32xf32>
    %cst_13 = arith.constant 1.000000e+00 : f32
    %38 = vector.broadcast %cst_13 : f32 to vector<8x32xf32>
    %39 = arith.mulf %21, %38 : vector<8x32xf32>
    %cst_14 = arith.constant dense<0.000000e+00> : vector<8x8xf32>
    %40 = tpu.matmul %39, %29, %cst_14 {dimension_numbers = #tpu.dot_dimension_numbers<[1], [1], [0], [0], [0, 0, 1, 0], [], []>} : vector<8x32xf32>, vector<8x32xf32>, vector<8x8xf32> -> vector<8x8xf32>
    %41 = math.exp %40 : vector<8x8xf32>
    %42 = arith.mulf %39, %29 : vector<8x32xf32>
    %cst_15 = arith.constant dense<0.000000e+00> : vector<8xf32>
    %43 = vector.multi_reduction <add>, %42, %cst_15 [1] : vector<8x32xf32> to vector<8xf32>
    %44 = vector.shape_cast %43 : vector<8xf32> to vector<8x1xf32>
    %45 = vector.shape_cast %44 : vector<8x1xf32> to vector<1x8x1xf32>
    %cst_16 = arith.constant dense<0.000000e+00> : vector<1xf32>
    %46 = vector.multi_reduction <add>, %45, %cst_16 [1, 2] : vector<1x8x1xf32> to vector<1xf32>
    %47 = vector.shape_cast %46 : vector<1xf32> to vector<1x1x1xf32>
    %48 = vector.extract %47[0, 0, 0] : f32 from vector<1x1x1xf32>
    %cst_17 = arith.constant 8.000000e+00 : f32
    %49 = arith.divf %48, %cst_17 : f32
    %cst_18 = arith.constant dense<0.000000e+00> : vector<8xf32>
    %50 = vector.multi_reduction <add>, %41, %cst_18 [1] : vector<8x8xf32> to vector<8xf32>
    %51 = vector.shape_cast %50 : vector<8xf32> to vector<8x1xf32>
    %52 = math.log %51 : vector<8x1xf32>
    %53 = vector.shape_cast %52 : vector<8x1xf32> to vector<1x8x1xf32>
    %cst_19 = arith.constant dense<0.000000e+00> : vector<1xf32>
    %54 = vector.multi_reduction <add>, %53, %cst_19 [1, 2] : vector<1x8x1xf32> to vector<1xf32>
    %55 = vector.shape_cast %54 : vector<1xf32> to vector<1x1x1xf32>
    %56 = vector.extract %55[0, 0, 0] : f32 from vector<1x1x1xf32>
    %cst_20 = arith.constant 8.000000e+00 : f32
    %57 = arith.divf %56, %cst_20 : f32
    %58 = arith.subf %57, %49 : f32
    %cst_21 = arith.constant dense<0.000000e+00> : vector<8xf32>
    %59 = vector.multi_reduction <add>, %41, %cst_21 [0] : vector<8x8xf32> to vector<8xf32>
    %60 = vector.shape_cast %59 : vector<8xf32> to vector<1x8xf32>
    %61 = math.log %60 : vector<1x8xf32>
    %62 = vector.shape_cast %61 : vector<1x8xf32> to vector<1x1x8xf32>
    %cst_22 = arith.constant dense<0.000000e+00> : vector<1xf32>
    %63 = vector.multi_reduction <add>, %62, %cst_22 [1, 2] : vector<1x1x8xf32> to vector<1xf32>
    %64 = vector.shape_cast %63 : vector<1xf32> to vector<1x1x1xf32>
    %65 = vector.extract %64[0, 0, 0] : f32 from vector<1x1x1xf32>
    %cst_23 = arith.constant 8.000000e+00 : f32
    %66 = arith.divf %65, %cst_23 : f32
    %67 = arith.subf %66, %49 : f32
    %cst_24 = arith.constant 1.000000e+00 : f32
    %68 = vector.broadcast %cst_24 : f32 to vector<8x32xf32>
    %69 = arith.mulf %13, %68 : vector<8x32xf32>
    %cst_25 = arith.constant dense<0.000000e+00> : vector<8x8xf32>
    %70 = tpu.matmul %69, %37, %cst_25 {dimension_numbers = #tpu.dot_dimension_numbers<[1], [1], [0], [0], [0, 0, 1, 0], [], []>} : vector<8x32xf32>, vector<8x32xf32>, vector<8x8xf32> -> vector<8x8xf32>
    %71 = math.exp %70 : vector<8x8xf32>
    %72 = arith.mulf %69, %37 : vector<8x32xf32>
    %cst_26 = arith.constant dense<0.000000e+00> : vector<8xf32>
    %73 = vector.multi_reduction <add>, %72, %cst_26 [1] : vector<8x32xf32> to vector<8xf32>
    %74 = vector.shape_cast %73 : vector<8xf32> to vector<8x1xf32>
    %75 = vector.shape_cast %74 : vector<8x1xf32> to vector<1x8x1xf32>
    %cst_27 = arith.constant dense<0.000000e+00> : vector<1xf32>
    %76 = vector.multi_reduction <add>, %75, %cst_27 [1, 2] : vector<1x8x1xf32> to vector<1xf32>
    %77 = vector.shape_cast %76 : vector<1xf32> to vector<1x1x1xf32>
    %78 = vector.extract %77[0, 0, 0] : f32 from vector<1x1x1xf32>
    %cst_28 = arith.constant 8.000000e+00 : f32
    %79 = arith.divf %78, %cst_28 : f32
    %cst_29 = arith.constant dense<0.000000e+00> : vector<8xf32>
    %80 = vector.multi_reduction <add>, %71, %cst_29 [1] : vector<8x8xf32> to vector<8xf32>
    %81 = vector.shape_cast %80 : vector<8xf32> to vector<8x1xf32>
    %82 = math.log %81 : vector<8x1xf32>
    %83 = vector.shape_cast %82 : vector<8x1xf32> to vector<1x8x1xf32>
    %cst_30 = arith.constant dense<0.000000e+00> : vector<1xf32>
    %84 = vector.multi_reduction <add>, %83, %cst_30 [1, 2] : vector<1x8x1xf32> to vector<1xf32>
    %85 = vector.shape_cast %84 : vector<1xf32> to vector<1x1x1xf32>
    %86 = vector.extract %85[0, 0, 0] : f32 from vector<1x1x1xf32>
    %cst_31 = arith.constant 8.000000e+00 : f32
    %87 = arith.divf %86, %cst_31 : f32
    %88 = arith.subf %87, %79 : f32
    %cst_32 = arith.constant dense<0.000000e+00> : vector<8xf32>
    %89 = vector.multi_reduction <add>, %71, %cst_32 [0] : vector<8x8xf32> to vector<8xf32>
    %90 = vector.shape_cast %89 : vector<8xf32> to vector<1x8xf32>
    %91 = math.log %90 : vector<1x8xf32>
    %92 = vector.shape_cast %91 : vector<1x8xf32> to vector<1x1x8xf32>
    %cst_33 = arith.constant dense<0.000000e+00> : vector<1xf32>
    %93 = vector.multi_reduction <add>, %92, %cst_33 [1, 2] : vector<1x1x8xf32> to vector<1xf32>
    %94 = vector.shape_cast %93 : vector<1xf32> to vector<1x1x1xf32>
    %95 = vector.extract %94[0, 0, 0] : f32 from vector<1x1x1xf32>
    %cst_34 = arith.constant 8.000000e+00 : f32
    %96 = arith.divf %95, %cst_34 : f32
    %97 = arith.subf %96, %79 : f32
    %cst_35 = arith.constant 9.900000e-01 : f32
    %98 = arith.mulf %cst_35, %58 : f32
    %cst_36 = arith.constant 0.00999999977 : f32
    %99 = arith.mulf %cst_36, %67 : f32
    %100 = arith.addf %98, %99 : f32
    %cst_37 = arith.constant 9.900000e-01 : f32
    %101 = arith.mulf %cst_37, %88 : f32
    %cst_38 = arith.constant 0.00999999977 : f32
    %102 = arith.mulf %cst_38, %97 : f32
    %103 = arith.addf %101, %102 : f32
    %cst_39 = arith.constant 7.500000e-01 : f32
    %104 = arith.mulf %cst_39, %103 : f32
    %cst_40 = arith.constant 2.500000e-01 : f32
    %105 = arith.mulf %cst_40, %100 : f32
    %106 = arith.addf %104, %105 : f32
    %c0_41 = arith.constant 0 : index
    %c0_42 = arith.constant 0 : index
    %107 = memref.load %arg3[%c0_41, %c0_42] : memref<1x1xf32, #tpu.memory_space<smem>>
    memref.store %106, %arg3[%c0_41, %c0_42] : memref<1x1xf32, #tpu.memory_space<smem>>
    return
  }
}

</mosaic_0001>

<bundles_post_ra>
// kernel: tpu_custom_call.1
= control target key start
LH: loop header
LB: loop body
LE: loop exit
PB: predicated region body
PF: predicated region fallthrough
CT: control target
= control target key end

     0   :  { %8 = vsyncpa [#allocation3], 0  ;;  %s658_s0 = inlined_call_operand.hbm [shape: f32[8,32], index: 0, kind: input, shape index: {}]   ;;  %s659_s1 = inlined_call_operand.hbm [shape: f32[8,32], index: 1, kind: input, shape index: {}]   ;;  %s660_s2 = inlined_call_operand.hbm [shape: f32[8,32], index: 2, kind: input, shape index: {}]   ;;  %s661_s3 = inlined_call_operand.hbm [shape: f32[1,1], index: 3, kind: output, shape index: {}]  }
   0x1   :  { %9 = vsyncpa [#allocation6], 0  ;;  %s27_s14 = sshll.u32 %s659_s1, 4  ;;  %s28_s14 = int_to_ptr.hbm [resolvable:$true] %s27_s14 }
   0x2   :  { %10 = vsyncpa [#allocation4], 0  ;;  %s572_s15 = smov [#allocation5]   ;;  %s16_s19 = sshll.u32 %s658_s0, 4  ;;  %s17_s19 = int_to_ptr.hbm [resolvable:$true] %s16_s19 }
   0x3   :  { %s29_s16 = sshll.u32 %s572_s15, 4  ;;  %s573_s20 = smov [#allocation2]   ;;  %s30_s16 = int_to_ptr.vmem [resolvable:$true] %s29_s16 }
   0x4   :  { %32 = dma.hbm_to_vmem [thread:$0]  %s28_s14, 128, %s30_s16, [#allocation6]  }
   0x5   :  { %s18_s21 = sshll.u32 %s573_s20, 4  ;;  %s38_s24 = sshll.u32 %s660_s2, 4  ;;  %s19_s21 = int_to_ptr.vmem [resolvable:$true] %s18_s21  ;;  %s39_s24 = int_to_ptr.hbm [resolvable:$true] %s38_s24 }
   0x6   :  { %21 = dma.hbm_to_vmem [thread:$0]  %s17_s19, 128, %s19_s21, [#allocation3]  }
   0x7   :  { %s574_s1 = smov [#allocation7]  }
   0x8   :  { %s40_s25 = sshll.u32 %s574_s1, 4  ;;  %s41_s25 = int_to_ptr.vmem [resolvable:$true] %s40_s25 }
   0x9   :  { %43 = dma.hbm_to_vmem [thread:$0]  %s39_s24, 128, %s41_s25, [#allocation6]  }
   0xa   :  { %566 = dma.done.wait [#allocation3], 128  }
   0xb   :  { %567 = vsyncadd [#allocation3], 4294967168 }
   0xc   :  { %568 = dma.done.wait [#allocation6], 256  }
   0xd   :  { %569 = vsyncadd [#allocation6], 4294967040  ;;  %v606_v0 = vld [vmem:[#allocation7] sm:$0xff]  ;;  %vm62_vm0 = vcmask 261120   ;;  %v608_v1 = vld [vmem:[#allocation2] sm:$0xff]  ;;  %s417_s23 = sshll.u32 %s661_s3, 4  ;;  %s418_s23 = int_to_ptr.hbm [resolvable:$true] %s417_s23 }
   0xe   :  { %v610_v2 = vld [vmem:[#allocation5] sm:$0xff]  ;;  %v126_v3 = vmul.f32 %v606_v0, %v606_v0  ;;  %v61_v4 = vmul.f32 %v608_v1, %v608_v1  ;;  %s576_s25 = smov [#allocation8]  }
   0xf   :  { %v59_v5 = vadd.f32 %v606_v0, %v610_v2  ;;  %v94_v10 = vmul.f32 %v610_v2, %v610_v2 }
  0x10   :  { %v127_v6 = vsel %vm62_vm0, %v126_v3, 0.0  ;;  %v63_v7 = vsel %vm62_vm0, %v61_v4, 0.0 }
  0x11   :  { %v620_v8 = vmul.f32 0.5, %v59_v5  ;;  %128 = vadd.xlane.f32.xlu0 %v127_v6  ;;  %64 = vadd.xlane.f32.xlu1 %v63_v7  ;;  %v95_v12 = vsel %vm62_vm0, %v94_v10, 0.0 }
  0x13   :  { %v158_v9 = vmul.f32 %v620_v8, %v620_v8 }
  0x15   :  { %v159_v11 = vsel %vm62_vm0, %v158_v9, 0.0 }
  0x19   :  { %160 = vadd.xlane.f32.xlu0 %v159_v11  ;;  %96 = vadd.xlane.f32.xlu1 %v95_v12 }
  0x84   :  { %v129_v13 = vpop.xlane.xlu0 %128  ;;  %v65_v14 = vpop.xlane.xlu1 %64 }
  0x85   :  { %452 = vrsqrt.f32 %v129_v13  ;;  %vm137_vm1 = vcmp.eq.f32.partialorder %v129_v13, inf  ;;  %vm139_vm2 = vcmp.eq.f32.partialorder %v129_v13, 0.0  ;;  %v140_v35 = vand.u32 2147483648, %v129_v13 }
  0x86   :  { %454 = vrsqrt.f32 %v65_v14  ;;  %vm73_vm3 = vcmp.eq.f32.partialorder %v65_v14, inf  ;;  %v76_v39 = vand.u32 2147483648, %v65_v14  ;;  %vm75_vm4 = vcmp.eq.f32.partialorder %v65_v14, 0.0 }
  0x8b   :  { %v453_v15 = vpop.eup %452 }
  0x8c   :  { %v455_v16 = vpop.eup %454  ;;  %v131_v17 = vmul.f32 %v453_v15, %v129_v13  ;;  %v161_v18 = vpop.xlane.xlu0 %160 }
  0x8d   :  { %v97_v19 = vpop.xlane.xlu1 %96  ;;  %v67_v20 = vmul.f32 %v455_v16, %v65_v14  ;;  %456 = vrsqrt.f32 %v161_v18  ;;  %vm169_vm5 = vcmp.eq.f32.partialorder %v161_v18, inf  ;;  %v172_v52 = vand.u32 2147483648, %v161_v18 }
  0x8e   :  { %v132_v21 = vmul.f32 %v453_v15, %v131_v17  ;;  %458 = vrsqrt.f32 %v97_v19  ;;  %vm171_vm6 = vcmp.eq.f32.partialorder %v161_v18, 0.0  ;;  %vm105_vm7 = vcmp.eq.f32.partialorder %v97_v19, inf }
  0x8f   :  { %v68_v22 = vmul.f32 %v455_v16, %v67_v20  ;;  %v108_v55 = vand.u32 2147483648, %v97_v19  ;;  %vm107_vm8 = vcmp.eq.f32.partialorder %v97_v19, 0.0 }
  0x90   :  { %v133_v23 = vmul.f32 0.5, %v132_v21 }
  0x91   :  { %v69_v24 = vmul.f32 0.5, %v68_v22 }
  0x92   :  { %v134_v25 = vsub.f32 1.5, %v133_v23 }
  0x93   :  { %v457_v26 = vpop.eup %456  ;;  %v70_v27 = vsub.f32 1.5, %v69_v24 }
  0x94   :  { %v459_v28 = vpop.eup %458  ;;  %v135_v29 = vmul.f32 %v453_v15, %v134_v25  ;;  %v163_v30 = vmul.f32 %v457_v26, %v161_v18 }
  0x95   :  { %v71_v31 = vmul.f32 %v455_v16, %v70_v27  ;;  %v99_v32 = vmul.f32 %v459_v28, %v97_v19 }
  0x96   :  { %v136_v33 = vmul.f32 %v135_v29, %v129_v13  ;;  %v164_v34 = vmul.f32 %v457_v26, %v163_v30 }
  0x97   :  { %v72_v36 = vmul.f32 %v71_v31, %v65_v14  ;;  %v100_v37 = vmul.f32 %v459_v28, %v99_v32 }
  0x98   :  { %v138_v38 = vsel %vm137_vm1, %v129_v13, %v136_v33  ;;  %v165_v40 = vmul.f32 0.5, %v164_v34 }
  0x99   :  { %v141_v41 = vsel %vm139_vm2, %v140_v35, %v138_v38  ;;  %v74_v42 = vsel %vm73_vm3, %v65_v14, %v72_v36  ;;  %v101_v43 = vmul.f32 0.5, %v100_v37 }
  0x9a   :  { %v77_v44 = vsel %vm75_vm4, %v76_v39, %v74_v42  ;;  %v166_v45 = vsub.f32 1.5, %v165_v40  ;;  %v142_v46 = vmax.f32 %v141_v41, 1e-08 }
  0x9b   :  { %v628_v47 = vmax.f32 %v77_v44, 1e-08  ;;  %v102_v48 = vsub.f32 1.5, %v101_v43 }
  0x9c   :  { %v167_v49 = vmul.f32 %v457_v26, %v166_v45  ;;  %460 = vrcp.f32 %v142_v46  ;;  %v154_v4 = vand.u32 2147483648, %v142_v46  ;;  %v152_v7 = vand.u32 2147483647, %v142_v46 }
  0x9d   :  { %462 = vrcp.f32 %v628_v47  ;;  %v103_v50 = vmul.f32 %v459_v28, %v102_v48  ;;  %vm148_vm10 = vweird.f32 %v142_v46  ;;  %v90_v20 = vand.u32 2147483648, %v628_v47 }
  0x9e   :  { %v168_v51 = vmul.f32 %v167_v49, %v161_v18  ;;  %v155_v12 = vor.u32 1.1754944e-38, %v154_v4  ;;  %vm153_vm12 = vcmp.eq.f32.partialorder %v152_v7, 8.507059e+37  ;;  %vm84_vm14 = vweird.f32 %v628_v47 }
  0x9f   :  { %v104_v53 = vmul.f32 %v103_v50, %v97_v19  ;;  %v88_v23 = vand.u32 2147483647, %v628_v47  ;;  %v91_v32 = vor.u32 1.1754944e-38, %v90_v20 }
  0xa0   :  { %v170_v54 = vsel %vm169_vm5, %v161_v18, %v168_v51 }
  0xa1   :  { %v173_v56 = vsel %vm171_vm6, %v172_v52, %v170_v54  ;;  %v106_v57 = vsel %vm105_vm7, %v97_v19, %v104_v53  ;;  %vm89_vm4 = vcmp.eq.f32.partialorder %v88_v23, 8.507059e+37 }
  0xa2   :  { %v461_v58 = vpop.eup %460  ;;  %v109_v59 = vsel %vm107_vm8, %v108_v55, %v106_v57  ;;  %v174_v60 = vmax.f32 %v173_v56, 1e-08 }
  0xa3   :  { %v463_v61 = vpop.eup %462  ;;  %v110_v62 = vmax.f32 %v109_v59, 1e-08  ;;  %v144_v63 = vmul.f32 %v461_v58, %v142_v46  ;;  %vm149_vm9 = vweird.f32 %v461_v58 }
  0xa4   :  { %464 = vrcp.f32 %v174_v60  ;;  %v80_v5 = vmul.f32 %v463_v61, %v628_v47  ;;  %vm150_vm11 = vmor %vm148_vm10, %vm149_vm9  ;;  %vm85_vm13 = vweird.f32 %v463_v61  ;;  %v184_v25 = vand.u32 2147483647, %v174_v60 }
  0xa5   :  { %466 = vrcp.f32 %v110_v62  ;;  %v145_v3 = vsub.f32 1.0, %v144_v63  ;;  %v186_v26 = vand.u32 2147483648, %v174_v60  ;;  %vm636_vm15 = vmor %vm84_vm14, %vm85_vm13  ;;  %v122_v28 = vand.u32 2147483648, %v110_v62 }
  0xa6   :  { %v81_v9 = vsub.f32 1.0, %v80_v5  ;;  %v120_v31 = vand.u32 2147483647, %v110_v62  ;;  %vm180_vm3 = vweird.f32 %v174_v60  ;;  %vm116_vm5 = vweird.f32 %v110_v62 }
  0xa7   :  { %v146_v6 = vmul.f32 %v461_v58, %v145_v3  ;;  %v187_v35 = vor.u32 1.1754944e-38, %v186_v26  ;;  %v123_v37 = vor.u32 1.1754944e-38, %v122_v28  ;;  %vm185_vm8 = vcmp.eq.f32.partialorder %v184_v25, 8.507059e+37 }
  0xa8   :  { %v82_v13 = vmul.f32 %v463_v61, %v81_v9  ;;  %vm121_vm9 = vcmp.eq.f32.partialorder %v120_v31, 8.507059e+37  ;;  %vm242_vm10 = vcmask 64512  }
  0xa9   :  { %v147_v10 = vadd.f32 %v461_v58, %v146_v6 }
  0xaa   :  { %v465_v11 = vpop.eup %464  ;;  %v83_v19 = vadd.f32 %v463_v61, %v82_v13 }
  0xab   :  { %v467_v14 = vpop.eup %466  ;;  %v151_v15 = vsel %vm150_vm11, %v461_v58, %v147_v10  ;;  %v176_v16 = vmul.f32 %v465_v11, %v174_v60  ;;  %vm181_vm1 = vweird.f32 %v465_v11  ;;  %vm276_vm11 = vcmask 57344  }
  0xac   :  { %v156_v17 = vsel %vm153_vm12, %v155_v12, %v151_v15  ;;  %v112_v18 = vmul.f32 %v467_v14, %v110_v62  ;;  %vm117_vm2 = vweird.f32 %v467_v14  ;;  %vm182_vm6 = vmor %vm180_vm3, %vm181_vm1 }
  0xad   :  { %v157_v21 = vmul.f32 %v156_v17, %v606_v0  ;;  %v177_v22 = vsub.f32 1.0, %v176_v16  ;;  %v87_v0 = vsel %vm636_vm15, %v463_v61, %v83_v19  ;;  %vm118_vm7 = vmor %vm116_vm5, %vm117_vm2  ;;  %v575_v17 = vmov 8.0  }
  0xae   :  { %v113_v24 = vsub.f32 1.0, %v112_v18  ;;  %v92_v36 = vsel %vm89_vm4, %v91_v32, %v87_v0 }
  0xaf   :  { %429 = vmatpush.xpose.msk.msra.mxu0 %vm62_vm0, %v157_v21  ;;  %v178_v29 = vmul.f32 %v465_v11, %v177_v22  ;;  %v93_v43 = vmul.f32 %v92_v36, %v608_v1 }
  0xb0   :  { %v114_v30 = vmul.f32 %v467_v14, %v113_v24 }
  0xb1   :  { %v179_v33 = vadd.f32 %v465_v11, %v178_v29 }
  0xb2   :  { %v115_v34 = vadd.f32 %v467_v14, %v114_v30 }
  0xb3   :  { %v183_v38 = vsel %vm182_vm6, %v465_v11, %v179_v33 }
  0xb4   :  { %v119_v39 = vsel %vm118_vm7, %v467_v14, %v115_v34  ;;  %v188_v40 = vsel %vm185_vm8, %v187_v35, %v183_v38 }
  0xb5   :  { %v124_v41 = vsel %vm121_vm9, %v123_v37, %v119_v39  ;;  %v189_v42 = vmul.f32 %v188_v40, %v620_v8 }
  0xb6   :  { %v125_v44 = vmul.f32 %v124_v41, %v610_v2 }
  0xb7   :  { %431 = vmatpush.xpose.msk.msra.mxu1 %vm62_vm0, %v189_v42  ;;  %v325_v45 = vmul.f32 %v189_v42, %v93_v43 }
  0xb8   :  { %430 = vmatmul.msk.f32.vlgmr.msra.gmra.mxu0 %vm62_vm0, %v125_v44  ;;  %v218_v46 = vmul.f32 %v157_v21, %v125_v44 }
  0xb9   :  { %v326_v47 = vsel %vm62_vm0, %v325_v45, 0.0 }
  0xba   :  { %327 = vadd.xlane.f32.xlu1 %v326_v47  ;;  %432 = vmatmul.msk.f32.vlgmr.msra.gmra.mxu1 %vm62_vm0, %v93_v43  ;;  %v219_v48 = vsel %vm62_vm0, %v218_v46, 0.0  ;;  %vm222_vm0 = vcmask 7168  }
  0xbb   :  { %220 = vadd.xlane.f32.xlu0 %v219_v48 }
 0x12d   :  { %v328_v10 = vpop.xlane.xlu1 %327 }
 0x12e   :  { %v221_v4 = vpop.xlane.xlu0 %220  ;;  %v329_v13 = vsel %vm222_vm0, %v328_v10, 0.0 }
 0x12f   :  { %v223_v6 = vsel %vm222_vm0, %v221_v4, 0.0 }
 0x135   :  { %v213_v49 = vpop.f32.mrf.mxu0 }
 0x136   :  { %v216_v8 = vmul.f32 1.442695, %v213_v49 }
 0x137   :  { %v320_v50 = vpop.f32.mrf.mxu1 }
 0x138   :  { %468 = vpow2.f32 %v216_v8  ;;  %v323_v1 = vmul.f32 1.442695, %v320_v50 }
 0x13a   :  { %470 = vpow2.f32 %v323_v1 }
 0x13e   :  { %v469_v2 = vpop.eup %468 }
 0x13f   :  { %v243_v51 = vsel %vm242_vm10, %v469_v2, 0.0 }
 0x140   :  { %v471_v52 = vpop.eup %470  ;;  %244 = vadd.xlane.f32.xlu2 %v243_v51  ;;  %v268_v53 = vrot.slane %v243_v51, 4 }
 0x141   :  { %v348_v54 = vsel %vm242_vm10, %v471_v52, 0.0 }
 0x142   :  { %v269_v55 = vadd.f32 %v268_v53, %v243_v51  ;;  %v373_v56 = vrot.slane %v348_v54, 4 }
 0x144   :  { %v270_v57 = vrot.slane %v269_v55, 2  ;;  %v374_v58 = vadd.f32 %v373_v56, %v348_v54 }
 0x146   :  { %v271_v59 = vadd.f32 %v270_v57, %v269_v55  ;;  %v375_v60 = vrot.slane %v374_v58, 2 }
 0x148   :  { %v376_v61 = vadd.f32 %v375_v60, %v374_v58  ;;  %349 = vadd.xlane.f32.xlu2 %v348_v54  ;;  %v272_v62 = vrot.slane %v271_v59, 1 }
 0x14a   :  { %v273_v63 = vadd.f32 %v272_v62, %v271_v59  ;;  %v377_v3 = vrot.slane %v376_v61, 1 }
 0x14c   :  { %472 = vlog2.f32 %v273_v63  ;;  %v378_v5 = vadd.f32 %v377_v3, %v376_v61 }
 0x14e   :  { %474 = vlog2.f32 %v378_v5 }
 0x150   :  { %224 = vadd.xlane.f32.xlu2 %v223_v6 }
 0x152   :  { %v473_v7 = vpop.eup %472 }
 0x153   :  { %v275_v9 = vmul.f32 0.6931472, %v473_v7 }
 0x154   :  { %v475_v12 = vpop.eup %474 }
 0x155   :  { %v277_v11 = vsel %vm276_vm11, %v275_v9, 0.0  ;;  %v380_v14 = vmul.f32 0.6931472, %v475_v12 }
 0x156   :  { %278 = vadd.xlane.f32.xlu1 %v277_v11 }
 0x157   :  { %v381_v15 = vsel %vm276_vm11, %v380_v14, 0.0 }
 0x158   :  { %330 = vadd.xlane.f32.xlu2 %v329_v13 }
 0x15e   :  { %382 = vadd.xlane.f32.xlu1 %v381_v15 }
 0x1b3   :  { %v245_v16 = vpop.xlane.xlu2 %244 }
 0x1b4   :  { %476 = vlog2.f32 %v245_v16 }
 0x1b5   :  { %478 = vrcp.f32 %v575_v17 }
 0x1ba   :  { %v477_v18 = vpop.eup %476 }
 0x1bb   :  { %v479_v19 = vpop.eup %478  ;;  %v247_v20 = vmul.f32 0.6931472, %v477_v18  ;;  %v350_v21 = vpop.xlane.xlu2 %349 }
 0x1bc   :  { %480 = vlog2.f32 %v350_v21  ;;  %v234_v23 = vmul.f32 8.0, %v479_v19  ;;  %vm238_vm12 = vweird.f32 %v479_v19 }
 0x1bd   :  { %v248_v22 = vsel %vm222_vm0, %v247_v20, 0.0 }
 0x1be   :  { %249 = vadd.xlane.f32.xlu0 %v248_v22  ;;  %v235_v25 = vsub.f32 1.0, %v234_v23 }
 0x1c0   :  { %v236_v30 = vmul.f32 %v479_v19, %v235_v25 }
 0x1c2   :  { %v481_v24 = vpop.eup %480  ;;  %v237_v33 = vadd.f32 %v479_v19, %v236_v30 }
 0x1c3   :  { %v352_v26 = vmul.f32 0.6931472, %v481_v24  ;;  %v225_v27 = vpop.xlane.xlu2 %224 }
 0x1c4   :  { %v226_v28 = vrot.slane %v225_v27, 4  ;;  %v239_v36 = vsel %vm238_vm12, %v479_v19, %v237_v33 }
 0x1c5   :  { %v353_v29 = vsel %vm222_vm0, %v352_v26, 0.0 }
 0x1c6   :  { %v227_v0 = vadd.f32 %v226_v28, %v225_v27  ;;  %354 = vadd.xlane.f32.xlu0 %v353_v29 }
 0x1c8   :  { %v228_v31 = vrot.slane %v227_v0, 2 }
 0x1c9   :  { %v279_v37 = vpop.xlane.xlu1 %278 }
 0x1ca   :  { %v229_v32 = vadd.f32 %v228_v31, %v227_v0  ;;  %v280_v39 = vrot.slane %v279_v37, 4 }
 0x1cb   :  { %v331_v38 = vpop.xlane.xlu2 %330 }
 0x1cc   :  { %v230_v34 = vrot.slane %v229_v32, 1  ;;  %v332_v40 = vrot.slane %v331_v38, 4  ;;  %v281_v41 = vadd.f32 %v280_v39, %v279_v37 }
 0x1ce   :  { %v231_v35 = vadd.f32 %v230_v34, %v229_v32  ;;  %v333_v42 = vadd.f32 %v332_v40, %v331_v38  ;;  %v282_v44 = vrot.slane %v281_v41, 2 }
 0x1d0   :  { %433 = vpush %v231_v35  ;;  %v334_v47 = vrot.slane %v333_v42, 2  ;;  %v283_v50 = vadd.f32 %v282_v44, %v281_v41 }
 0x1d1   :  { %435 = vpush %v239_v36  ;;  %v383_v43 = vpop.xlane.xlu1 %382 }
 0x1d2   :  { %v384_v45 = vrot.slane %v383_v43, 4  ;;  %v335_v1 = vadd.f32 %v334_v47, %v333_v42  ;;  %v284_v54 = vrot.slane %v283_v50, 1 }
 0x1d4   :  { %v385_v8 = vadd.f32 %v384_v45, %v383_v43  ;;  %v336_v57 = vrot.slane %v335_v1, 1  ;;  %v285_v61 = vadd.f32 %v284_v54, %v283_v50 }
 0x1d6   :  { %v386_v52 = vrot.slane %v385_v8, 2  ;;  %v337_v63 = vadd.f32 %v336_v57, %v335_v1 }
 0x1d8   :  { %v387_v60 = vadd.f32 %v386_v52, %v385_v8 }
 0x1da   :  { %v388_v4 = vrot.slane %v387_v60, 1 }
 0x1dc   :  { %v389_v7 = vadd.f32 %v388_v4, %v387_v60 }
 0x201   :  { %s434_s0 = spop %433 }
 0x202   :  { %s436_s2 = spop %435 }
 0x203   :  { %s241_s26 = smul.f32 %s436_s2, %s434_s0 }
 0x231   :  { %v250_v46 = vpop.xlane.xlu0 %249 }
 0x232   :  { %v251_v48 = vrot.slane %v250_v46, 4 }
 0x234   :  { %v252_v49 = vadd.f32 %v251_v48, %v250_v46 }
 0x236   :  { %v253_v2 = vrot.slane %v252_v49, 2 }
 0x238   :  { %v254_v51 = vadd.f32 %v253_v2, %v252_v49 }
 0x239   :  { %v355_v53 = vpop.xlane.xlu0 %354 }
 0x23a   :  { %v356_v55 = vrot.slane %v355_v53, 4  ;;  %v255_v56 = vrot.slane %v254_v51, 1 }
 0x23c   :  { %v357_v58 = vadd.f32 %v356_v55, %v355_v53  ;;  %v256_v59 = vadd.f32 %v255_v56, %v254_v51 }
 0x23e   :  { %v358_v62 = vrot.slane %v357_v58, 2  ;;  %437 = vpush %v256_v59 }
 0x23f   :  { %439 = vpush %v285_v61 }
 0x240   :  { %v359_v3 = vadd.f32 %v358_v62, %v357_v58  ;;  %441 = vpush %v337_v63 }
 0x242   :  { %v360_v5 = vrot.slane %v359_v3, 1 }
 0x244   :  { %v361_v6 = vadd.f32 %v360_v5, %v359_v3 }
 0x246   :  { %443 = vpush %v361_v6 }
 0x247   :  { %445 = vpush %v389_v7 }
 0x26f   :  { %s438_s27 = spop %437 }
 0x270   :  { %s266_s28 = smul.f32 %s438_s27, %s436_s2  ;;  %s440_s29 = spop %439 }
 0x271   :  { %s295_s30 = smul.f32 %s440_s29, %s436_s2  ;;  %s442_s5 = spop %441 }
 0x272   :  { %s267_s4 = ssub.f32 %s266_s28, %s241_s26  ;;  %s347_s7 = smul.f32 %s442_s5, %s436_s2 }
 0x273   :  { %s296_s6 = ssub.f32 %s295_s30, %s241_s26 }
 0x274   :  { %s401_s8 = smul.f32 0.99, %s267_s4 }
 0x275   :  { %s402_s12 = smul.f32 0.01, %s296_s6 }
 0x277   :  { %s444_s9 = spop %443  ;;  %s403_s17 = sadd.f32 %s402_s12, %s401_s8 }
 0x278   :  { %s371_s10 = smul.f32 %s444_s9, %s436_s2  ;;  %s446_s11 = spop %445 }
 0x279   :  { %s399_s14 = smul.f32 %s446_s11, %s436_s2 }
 0x27a   :  { %s372_s13 = ssub.f32 %s371_s10, %s347_s7  ;;  %s408_s20 = smul.f32 0.25, %s403_s17 }
 0x27b   :  { %s400_s16 = ssub.f32 %s399_s14, %s347_s7 }
 0x27c   :  { %s404_s15 = smul.f32 0.99, %s372_s13 }
 0x27d   :  { %s405_s18 = smul.f32 0.01, %s400_s16 }
 0x27f   :  { %s406_s19 = sadd.f32 %s405_s18, %s404_s15 }
 0x281   :  { %s407_s24 = smul.f32 0.75, %s406_s19 }
 0x283   :  { %s409_s1 = sadd.f32 %s408_s20, %s407_s24 }
 0x285   :  { %411 = sst [smem:[#allocation8]] %s409_s1 }
 0x286   :  { %420 = dma.smem_to_hbm %s576_s25, 16, %s418_s23, [#allocation4]  }
 0x287   :  { %570 = dma.done.wait [#allocation4], 16  }
 0x288   :  { %571 = vsyncadd [#allocation4], 4294967280 }
 0x289   :  { %425 = sfence }
 0x28a   :  { %426 = vsyncpa [#allocation3], 1 }
 0x28b   :  { %427 = vsyncpa [#allocation6], 1 }
 0x28c   :  { %428 = vsyncpa [#allocation4], 1 }

</bundles_post_ra>
